<compile_context>
chip_gen: v7x
topology: tpu7x:2x2x1
jax: 0.10.0
libtpu: 0.0.40
codegen_flags: <defaults>
</compile_context>

<pallas_src>
import math

import jax
import jax.numpy as jnp
from jax.experimental import pallas as pl
from jax.experimental.pallas import tpu as pltpu


def cos_anneal(e0, e1, t0, t1, e):
    alpha = max(0, min(1, (e - e0) / (e1 - e0)))
    alpha = 1.0 - math.cos(alpha * math.pi / 2)
    return alpha * t1 + (1 - alpha) * t0


def _round_up(x, m):
    return ((x + m - 1) // m) * m


def _derive_tile_b(batch, n_e, e_dim_pad, requested=None, budget_bytes=28 << 20):
    """Largest 8-multiple batch tile whose VMEM footprint fits the budget.

    Footprint model: z / noise / qy tiles double-buffered (3 x 2), ~6 full-tile f32
    elementwise temporaries, z_q tile double-buffered, plus the single-buffered bf16
    codebook and ~1 MiB slack for Mosaic internal scratch.
    """
    b8 = _round_up(batch, 8)
    if requested is not None:
        return max(8, min(_round_up(requested, 8), b8))
    codebook_bytes = 2 * n_e * e_dim_pad                     # bf16, Buffered(1)
    per_row_bytes = 4 * (12 * n_e + 2 * e_dim_pad)
    tb = (budget_bytes - codebook_bytes - (1 << 20)) // per_row_bytes
    tb = max(8, min(tb, 4096, b8))
    tb = (tb // 256) * 256 if tb >= 512 else (tb // 8) * 8
    tb = max(tb, 8)
    # keep >= 2 grid steps when the batch allows, so "parallel" can shard across TensorCores
    if tb >= batch and batch > 8:
        tb = min(tb, _round_up((batch + 1) // 2, 8))
    return tb


def _make_vq_kernel(n_e, tb, batch):
    log_n_e = math.log(float(n_e))

    def kernel(invtau_ref, z_ref, g_ref, w_ref, zq_ref, qy_ref, stats_ref):
        tile = pl.program_id(0)
        inv_tau = invtau_ref[0]

        z = z_ref[...].astype(jnp.float32)               # (TB, n_e) logits
        g = g_ref[...].astype(jnp.float32)               # (TB, n_e) Gumbel(0,1) noise

        # row-validity mask for the (possibly clipped) last tile; jnp.where masking is
        # NaN/Inf-safe even if the clipped rows contain garbage.
        row_id = tile * tb + jax.lax.broadcasted_iota(jnp.int32, (tb, 1), 0)
        valid = row_id < batch                           # (TB, 1) bool

        # ---- gumbel-softmax logits: y = (z + g) / tau ----
        y = (z + g) * inv_tau
        y_max = jnp.max(y, axis=1, keepdims=True)

        # ---- hard argmax one-hot counts for perplexity (pre-exp; ties -> first index) ----
        lane = jax.lax.broadcasted_iota(jnp.int32, (tb, n_e), 1)
        idx = jnp.min(jnp.where(y == y_max, lane, n_e), axis=1, keepdims=True)
        one_hot = jnp.where(valid & (lane == idx), 1.0, 0.0)
        counts = jnp.sum(one_hot, axis=0, keepdims=True)  # (1, n_e)

        # ---- soft_one_hot = softmax(y); z_q = soft @ W  (bf16 MXU, f32 accumulate) ----
        ey = jnp.exp(y - y_max)
        soft = ey / jnp.sum(ey, axis=1, keepdims=True)
        w = w_ref[...]
        zq = jnp.dot(soft.astype(w.dtype), w, preferred_element_type=jnp.float32)
        zq_ref[...] = zq.astype(zq_ref.dtype)

        # ---- qy = softmax(z) (exact divide) and partial KL via the log-softmax identity ----
        z_max = jnp.max(z, axis=1, keepdims=True)
        zs = z - z_max
        ez = jnp.exp(zs)
        sz = jnp.sum(ez, axis=1, keepdims=True)
        qy = ez / sz
        qy_ref[...] = qy.astype(qy_ref.dtype)

        # log(qy * n_e) == (z - max) - log(sum_exp) + log(n_e); log only on the (TB,1) row-sum.
        log_qy_ne = zs - jnp.log(sz) + log_n_e
        kl_rows = jnp.sum(qy * log_qy_ne, axis=1, keepdims=True)      # (TB, 1)
        kl_sum = jnp.sum(jnp.where(valid, kl_rows, 0.0))              # scalar

        # ---- per-tile stats tile: sublane 0 = one-hot counts, sublane 1 = kl partial sum ----
        sub = jax.lax.broadcasted_iota(jnp.int32, (8, n_e), 0)
        stats_ref[...] = jnp.where(sub == 0, jnp.broadcast_to(counts, (8, n_e)),
                                   jnp.where(sub == 1, kl_sum, 0.0))

    return kernel


def data_dependent_vq_forward(z, embedding_weight, *, seed=0, temperature=1.0,
                              iter_count=1, training=True, tile_b=None):
    """Returns (loss, z_q, perplexity, d(=qy), embedding_weight), matching the torch module."""
    B, n_e = z.shape
    n_e_w, e_dim = embedding_weight.shape
    assert n_e_w == n_e, "embedding codebook size must match logits width"

    # ---- lane-density decision for the z_q store ----
    e128 = _round_up(e_dim, 128)
    if e_dim == e128:
        e_dim_pad = e_dim
    elif 8 * (e128 - e_dim) <= (2 * n_e + e_dim):
        e_dim_pad = e128          # padding adds <~12% HBM traffic -> buy lane-dense stores
    else:
        e_dim_pad = e_dim         # full-array last dim (exempt from 128 rule), masked stores

    # ---- VMEM-aware batch tile ----
    tb = _derive_tile_b(B, n_e, e_dim_pad, tile_b)
    num_tiles = (B + tb - 1) // tb

    # bf16 codebook: halves HBM read + VMEM residency; MXU is bf16-native.
    w_p = embedding_weight.astype(jnp.bfloat16)
    if e_dim_pad != e_dim:
        w_p = jnp.pad(w_p, ((0, 0), (0, e_dim_pad - e_dim)))

    # Gumbel(0,1) noise generated with jax.random (portable; deterministic per seed,
    # independent of tile size).
    g = jax.random.gumbel(jax.random.PRNGKey(seed), (B, n_e), dtype=jnp.float32)

    kernel = _make_vq_kernel(n_e, tb, B)

    out_shape = (
        jax.ShapeDtypeStruct((B, e_dim_pad), jnp.float32),          # z_q
        jax.ShapeDtypeStruct((B, n_e), jnp.float32),                # qy
        jax.ShapeDtypeStruct((num_tiles * 8, n_e), jnp.float32),    # per-tile stats
    )

    # Single-buffer the VMEM-resident codebook (constant index_map); guarded so the script
    # still runs on jax versions without BlockSpec.pipeline_mode.
    buffered = getattr(pl, "Buffered", None)
    w_spec = pl.BlockSpec((n_e, e_dim_pad), lambda i, *_: (0, 0))
    if buffered is not None:
        try:
            w_spec = pl.BlockSpec((n_e, e_dim_pad), lambda i, *_: (0, 0),
                                  pipeline_mode=buffered(1))
        except TypeError:
            pass

    grid_spec = pltpu.PrefetchScalarGridSpec(
        num_scalar_prefetch=1,                                       # 1/tau (SMEM scalar)
        grid=(num_tiles,),
        in_specs=[
            pl.BlockSpec((tb, n_e), lambda i, *_: (i, 0)),           # z tile
            pl.BlockSpec((tb, n_e), lambda i, *_: (i, 0)),           # gumbel noise tile
            w_spec,                                                  # codebook (resident)
        ],
        out_specs=[
            pl.BlockSpec((tb, e_dim_pad), lambda i, *_: (i, 0)),     # z_q tile
            pl.BlockSpec((tb, n_e), lambda i, *_: (i, 0)),           # qy tile
            pl.BlockSpec((8, n_e), lambda i, *_: (i, 0)),            # stats tile
        ],
    )

    itemsize = 4
    cost = pl.CostEstimate(
        flops=2 * B * n_e * e_dim_pad + 16 * B * n_e,
        transcendentals=2 * B * n_e + 2 * B,
        bytes_accessed=itemsize * (B * n_e * 3 + B * e_dim_pad + num_tiles * 8 * n_e)
                       + 2 * n_e * e_dim_pad,
    )

    invtau_arr = jnp.asarray([1.0 / float(temperature)], dtype=jnp.float32)

    zq_p, qy, stats = pl.pallas_call(
        kernel,
        grid_spec=grid_spec,
        out_shape=out_shape,
        compiler_params=pltpu.CompilerParams(
            dimension_semantics=("parallel",),
            vmem_limit_bytes=32 * 2**20,          # safe headroom on v7x's 64 MiB VMEM
        ),
        cost_estimate=cost,
    )(invtau_arr, z, g, w_p)

    # ---- tiny cross-tile finalize (mean / perplexity) in the wrapper ----
    stats = stats.reshape(num_tiles, 8, n_e)
    counts = jnp.sum(stats[:, 0, :], axis=0)      # (n_e,) hard one-hot usage counts
    kl_total = jnp.sum(stats[:, 1, 0])            # sum over valid rows of KL terms

    loss_coeff = cos_anneal(0, 4500, 0, 0.01, iter_count)
    loss = (loss_coeff * kl_total / B) if training else jnp.float32(0.0)

    avg_probs = counts / B
    perplexity = jnp.exp(-jnp.sum(avg_probs * jnp.log(avg_probs + 1e-10)))

    z_q = zq_p[:, :e_dim] if e_dim_pad != e_dim else zq_p
    return loss, z_q, perplexity, qy, embedding_weight


if __name__ == "__main__":
    # Module hyperparameters (dim=e_dim, codebook_size=n_e); small but multi-tile test:
    # B=20 with tile_b=8 -> 3 batch tiles, last one partial (exercises row masking + clipping).
    e_dim = 32
    n_e = 128
    B = 20
    temperature = 1.0
    iter_count = 2250     # non-trivial cos_anneal coefficient
    seed = 1234

    key = jax.random.PRNGKey(0)
    k_z, k_w = jax.random.split(key)
    z = jax.random.normal(k_z, (B, n_e), dtype=jnp.float32)
    emb_w = jax.random.uniform(k_w, (n_e, e_dim), dtype=jnp.float32,
                               minval=-1.0 / n_e, maxval=1.0 / n_e)

    outs = data_dependent_vq_forward(z, emb_w, seed=seed, temperature=temperature,
                                     iter_count=iter_count, training=True, tile_b=8)
    loss, z_q, perplexity, qy, w_out = jax.block_until_ready(outs)

    # ---- correctness checks ----
    # deterministic pieces (independent of the Gumbel draw)
    qy_ref = jax.nn.softmax(z, axis=1)
    assert qy.shape == (B, n_e)
    assert jnp.allclose(qy, qy_ref, atol=2e-3, rtol=1e-3), "qy mismatch"

    lc = cos_anneal(0, 4500, 0, 0.01, iter_count)
    loss_ref = lc * jnp.mean(jnp.sum(qy_ref * jnp.log(qy_ref * n_e + 1e-10), axis=1))
    assert jnp.allclose(loss, loss_ref, rtol=1e-2, atol=1e-7), "loss mismatch"

    # z_q is a convex combination of codebook rows -> stays inside the per-dim hull
    assert z_q.shape == (B, e_dim)
    assert bool(jnp.all(jnp.isfinite(z_q)))
    lo = jnp.min(emb_w, axis=0) - 1e-3
    hi = jnp.max(emb_w, axis=0) + 1e-3
    assert bool(jnp.all((z_q >= lo) & (z_q <= hi))), "z_q outside codebook hull"

    # perplexity of a distribution over n_e codes lies in [1, n_e]
    assert bool(jnp.isfinite(perplexity))
    assert 1.0 - 1e-3 <= float(perplexity) <= n_e + 1e-3, "perplexity out of range"

    # same seed -> identical stochastic outputs
    outs2 = data_dependent_vq_forward(z, emb_w, seed=seed, temperature=temperature,
                                      iter_count=iter_count, training=True, tile_b=8)
    loss2, z_q2, perp2, qy2, _ = jax.block_until_ready(outs2)
    assert bool(jnp.array_equal(z_q, z_q2)), "non-deterministic z_q for fixed seed"
    assert bool(jnp.array_equal(perplexity, perp2)), "non-deterministic perplexity"

    assert w_out is emb_w or bool(jnp.array_equal(w_out, emb_w))

    print("KERNEL_OK")
</pallas_src>

<mosaic_0001>
module attributes {stable_mosaic.version = 11 : i64} {
  func.func @kernel(%arg0: i32, %arg1: memref<1xf32, #tpu.memory_space<smem>>, %arg2: memref<8x128xf32, #tpu.memory_space<vmem>>, %arg3: memref<8x128xf32, #tpu.memory_space<vmem>>, %arg4: memref<128x32xbf16, #tpu.memory_space<vmem>>, %arg5: memref<8x32xf32, #tpu.memory_space<vmem>>, %arg6: memref<8x128xf32, #tpu.memory_space<vmem>>, %arg7: memref<8x128xf32, #tpu.memory_space<vmem>>) attributes {dimension_semantics = [#tpu.dimension_semantics<parallel>], iteration_bounds = array<i64: 3>, scalar_prefetch = 1 : i64, scratch_operands = 0 : i64, tpu.core_type = #tpu.core_type<tc>, window_params = [{transform_indices = @transform_0, window_bounds = array<i64: 8, 128>}, {transform_indices = @transform_1, window_bounds = array<i64: 8, 128>}, {pipeline_mode = #tpu.pipeline_mode<synchronous>, transform_indices = @transform_2, window_bounds = array<i64: 128, 32>}, {transform_indices = @transform_3, window_bounds = array<i64: 8, 32>}, {transform_indices = @transform_4, window_bounds = array<i64: 8, 128>}, {transform_indices = @transform_5, window_bounds = array<i64: 8, 128>}]} {
    %c0 = arith.constant 0 : index
    %0 = memref.load %arg1[%c0] : memref<1xf32, #tpu.memory_space<smem>>
    %c0_0 = arith.constant 0 : index
    %c0_1 = arith.constant 0 : index
    %1 = vector.load %arg2[%c0_0, %c0_1] : memref<8x128xf32, #tpu.memory_space<vmem>>, vector<8x128xf32>
    %c0_2 = arith.constant 0 : index
    %c0_3 = arith.constant 0 : index
    %2 = vector.load %arg3[%c0_2, %c0_3] : memref<8x128xf32, #tpu.memory_space<vmem>>, vector<8x128xf32>
    %c8_i32 = arith.constant 8 : i32
    %3 = arith.muli %arg0, %c8_i32 : i32
    %4 = tpu.iota {dimensions = array<i32: 0>} : vector<8x1xi32>
    %5 = vector.broadcast %3 : i32 to vector<8x1xi32>
    %6 = arith.addi %5, %4 : vector<8x1xi32>
    %c20_i32 = arith.constant 20 : i32
    %7 = vector.broadcast %c20_i32 : i32 to vector<8x1xi32>
    %8 = arith.cmpi slt, %6, %7 : vector<8x1xi32>
    %9 = arith.addf %1, %2 : vector<8x128xf32>
    %10 = vector.broadcast %0 : f32 to vector<8x128xf32>
    %11 = arith.mulf %9, %10 : vector<8x128xf32>
    %cst = arith.constant dense<0xFF800000> : vector<8xf32>
    %12 = vector.multi_reduction <maximumf>, %11, %cst [1] : vector<8x128xf32> to vector<8xf32>
    %13 = vector.shape_cast %12 : vector<8xf32> to vector<8x1xf32>
    %14 = tpu.iota {dimensions = array<i32: 1>} : vector<8x128xi32>
    %15 = vector.broadcast %13 : vector<8x1xf32> to vector<8x128xf32>
    %16 = arith.cmpf oeq, %11, %15 : vector<8x128xf32>
    %c128_i32 = arith.constant 128 : i32
    %17 = vector.broadcast %c128_i32 : i32 to vector<8x128xi32>
    %18 = arith.select %16, %14, %17 : vector<8x128xi1>, vector<8x128xi32>
    %cst_4 = arith.constant dense<2147483647> : vector<8xi32>
    %19 = vector.multi_reduction <minsi>, %18, %cst_4 [1] : vector<8x128xi32> to vector<8xi32>
    %20 = vector.shape_cast %19 : vector<8xi32> to vector<8x1xi32>
    %21 = vector.broadcast %20 : vector<8x1xi32> to vector<8x128xi32>
    %22 = arith.cmpi eq, %14, %21 : vector<8x128xi32>
    %23 = vector.broadcast %8 : vector<8x1xi1> to vector<8x128xi1>
    %24 = arith.andi %23, %22 : vector<8x128xi1>
    %cst_5 = arith.constant 1.000000e+00 : f32
    %cst_6 = arith.constant 0.000000e+00 : f32
    %25 = vector.broadcast %cst_5 : f32 to vector<8x128xf32>
    %26 = vector.broadcast %cst_6 : f32 to vector<8x128xf32>
    %27 = arith.select %24, %25, %26 : vector<8x128xi1>, vector<8x128xf32>
    %cst_7 = arith.constant dense<0.000000e+00> : vector<128xf32>
    %28 = vector.multi_reduction <add>, %27, %cst_7 [0] : vector<8x128xf32> to vector<128xf32>
    %29 = vector.shape_cast %28 : vector<128xf32> to vector<1x128xf32>
    %30 = vector.broadcast %13 : vector<8x1xf32> to vector<8x128xf32>
    %31 = arith.subf %11, %30 : vector<8x128xf32>
    %32 = math.exp %31 : vector<8x128xf32>
    %cst_8 = arith.constant dense<0.000000e+00> : vector<8xf32>
    %33 = vector.multi_reduction <add>, %32, %cst_8 [1] : vector<8x128xf32> to vector<8xf32>
    %34 = vector.shape_cast %33 : vector<8xf32> to vector<8x1xf32>
    %35 = vector.broadcast %34 : vector<8x1xf32> to vector<8x128xf32>
    %36 = arith.divf %32, %35 : vector<8x128xf32>
    %c0_9 = arith.constant 0 : index
    %c0_10 = arith.constant 0 : index
    %37 = vector.load %arg4[%c0_9, %c0_10] : memref<128x32xbf16, #tpu.memory_space<vmem>>, vector<128x32xbf16>
    %38 = arith.truncf %36 : vector<8x128xf32> to vector<8x128xbf16>
    %cst_11 = arith.constant dense<0.000000e+00> : vector<8x32xf32>
    %39 = tpu.matmul %38, %37, %cst_11 {dimension_numbers = #tpu.dot_dimension_numbers<[1], [0], [0], [1], [0, 0, 1, 1], [], []>} : vector<8x128xbf16>, vector<128x32xbf16>, vector<8x32xf32> -> vector<8x32xf32>
    %c0_12 = arith.constant 0 : index
    %c0_13 = arith.constant 0 : index
    %40 = vector.load %arg5[%c0_12, %c0_13] : memref<8x32xf32, #tpu.memory_space<vmem>>, vector<8x32xf32>
    tpu.vector_store %arg5[%c0_12, %c0_13], %39 {strides = array<i32>} : memref<8x32xf32, #tpu.memory_space<vmem>>, vector<8x32xf32>,
    %cst_14 = arith.constant dense<0xFF800000> : vector<8xf32>
    %41 = vector.multi_reduction <maximumf>, %1, %cst_14 [1] : vector<8x128xf32> to vector<8xf32>
    %42 = vector.shape_cast %41 : vector<8xf32> to vector<8x1xf32>
    %43 = vector.broadcast %42 : vector<8x1xf32> to vector<8x128xf32>
    %44 = arith.subf %1, %43 : vector<8x128xf32>
    %45 = math.exp %44 : vector<8x128xf32>
    %cst_15 = arith.constant dense<0.000000e+00> : vector<8xf32>
    %46 = vector.multi_reduction <add>, %45, %cst_15 [1] : vector<8x128xf32> to vector<8xf32>
    %47 = vector.shape_cast %46 : vector<8xf32> to vector<8x1xf32>
    %48 = vector.broadcast %47 : vector<8x1xf32> to vector<8x128xf32>
    %49 = arith.divf %45, %48 : vector<8x128xf32>
    %c0_16 = arith.constant 0 : index
    %c0_17 = arith.constant 0 : index
    %50 = vector.load %arg6[%c0_16, %c0_17] : memref<8x128xf32, #tpu.memory_space<vmem>>, vector<8x128xf32>
    tpu.vector_store %arg6[%c0_16, %c0_17], %49 {strides = array<i32>} : memref<8x128xf32, #tpu.memory_space<vmem>>, vector<8x128xf32>,
    %51 = math.log %47 : vector<8x1xf32>
    %52 = vector.broadcast %51 : vector<8x1xf32> to vector<8x128xf32>
    %53 = arith.subf %44, %52 : vector<8x128xf32>
    %cst_18 = arith.constant 4.85203028 : f32
    %54 = vector.broadcast %cst_18 : f32 to vector<8x128xf32>
    %55 = arith.addf %53, %54 : vector<8x128xf32>
    %56 = arith.mulf %49, %55 : vector<8x128xf32>
    %cst_19 = arith.constant dense<0.000000e+00> : vector<8xf32>
    %57 = vector.multi_reduction <add>, %56, %cst_19 [1] : vector<8x128xf32> to vector<8xf32>
    %58 = vector.shape_cast %57 : vector<8xf32> to vector<8x1xf32>
    %cst_20 = arith.constant 0.000000e+00 : f32
    %59 = vector.broadcast %cst_20 : f32 to vector<8x1xf32>
    %60 = arith.select %8, %58, %59 : vector<8x1xi1>, vector<8x1xf32>
    %61 = vector.shape_cast %60 : vector<8x1xf32> to vector<1x8x1xf32>
    %cst_21 = arith.constant dense<0.000000e+00> : vector<1xf32>
    %62 = vector.multi_reduction <add>, %61, %cst_21 [1, 2] : vector<1x8x1xf32> to vector<1xf32>
    %63 = vector.shape_cast %62 : vector<1xf32> to vector<1x1x1xf32>
    %64 = vector.extract %63[0, 0, 0] : f32 from vector<1x1x1xf32>
    %65 = tpu.iota {dimensions = array<i32: 0>} : vector<8x128xi32>
    %c0_i32 = arith.constant 0 : i32
    %66 = vector.broadcast %c0_i32 : i32 to vector<8x128xi32>
    %67 = arith.cmpi eq, %65, %66 : vector<8x128xi32>
    %68 = vector.shape_cast %29 : vector<1x128xf32> to vector<1x128xf32>
    %69 = vector.broadcast %68 : vector<1x128xf32> to vector<8x128xf32>
    %c1_i32 = arith.constant 1 : i32
    %70 = vector.broadcast %c1_i32 : i32 to vector<8x128xi32>
    %71 = arith.cmpi eq, %65, %70 : vector<8x128xi32>
    %cst_22 = arith.constant 0.000000e+00 : f32
    %72 = vector.broadcast %64 : f32 to vector<8x128xf32>
    %73 = vector.broadcast %cst_22 : f32 to vector<8x128xf32>
    %74 = arith.select %71, %72, %73 : vector<8x128xi1>, vector<8x128xf32>
    %75 = arith.select %67, %69, %74 : vector<8x128xi1>, vector<8x128xf32>
    %c0_23 = arith.constant 0 : index
    %c0_24 = arith.constant 0 : index
    %76 = vector.load %arg7[%c0_23, %c0_24] : memref<8x128xf32, #tpu.memory_space<vmem>>, vector<8x128xf32>
    tpu.vector_store %arg7[%c0_23, %c0_24], %75 {strides = array<i32>} : memref<8x128xf32, #tpu.memory_space<vmem>>, vector<8x128xf32>,
    return
  }
  func.func @transform_0(%arg0: i32, %arg1: memref<1xf32, #tpu.memory_space<smem>>) -> (i32, i32) {
    %c0_i32 = arith.constant 0 : i32
    %c0_i32_0 = arith.constant 0 : i32
    return %arg0, %c0_i32 : i32, i32
  }
  func.func @transform_1(%arg0: i32, %arg1: memref<1xf32, #tpu.memory_space<smem>>) -> (i32, i32) {
    %c0_i32 = arith.constant 0 : i32
    %c0_i32_0 = arith.constant 0 : i32
    return %arg0, %c0_i32 : i32, i32
  }
  func.func @transform_2(%arg0: i32, %arg1: memref<1xf32, #tpu.memory_space<smem>>) -> (i32, i32) {
    %c0_i32 = arith.constant 0 : i32
    %c0_i32_0 = arith.constant 0 : i32
    %c0_i32_1 = arith.constant 0 : i32
    return %c0_i32, %c0_i32_0 : i32, i32
  }
  func.func @transform_3(%arg0: i32, %arg1: memref<1xf32, #tpu.memory_space<smem>>) -> (i32, i32) {
    %c0_i32 = arith.constant 0 : i32
    %c0_i32_0 = arith.constant 0 : i32
    return %arg0, %c0_i32 : i32, i32
  }
  func.func @transform_4(%arg0: i32, %arg1: memref<1xf32, #tpu.memory_space<smem>>) -> (i32, i32) {
    %c0_i32 = arith.constant 0 : i32
    %c0_i32_0 = arith.constant 0 : i32
    return %arg0, %c0_i32 : i32, i32
  }
  func.func @transform_5(%arg0: i32, %arg1: memref<1xf32, #tpu.memory_space<smem>>) -> (i32, i32) {
    %c0_i32 = arith.constant 0 : i32
    %c0_i32_0 = arith.constant 0 : i32
    return %arg0, %c0_i32 : i32, i32
  }
}

</mosaic_0001>

<bundles_post_ra>
// kernel: tpu_custom_call.1
= control target key start
LH: loop header
LB: loop body
LE: loop exit
PB: predicated region body
PF: predicated region fallthrough
CT: control target
= control target key end

     0   :  { %s1164_s0 = inlined_call_operand.<no memory space> [shape: f32[1], index: 0, kind: input, shape index: {}]   ;;  %s1165_s1 = inlined_call_operand.vmem [shape: f32[20,128], index: 1, kind: input, shape index: {}]   ;;  %s1166_s2 = inlined_call_operand.vmem [shape: f32[20,128], index: 2, kind: input, shape index: {}]   ;;  %s1167_s3 = inlined_call_operand.vmem [shape: bf16[128,32], index: 3, kind: input, shape index: {}]   ;;  %s1168_s4 = inlined_call_operand.hbm [shape: f32[20,32], index: 4, kind: output, shape index: {0}]   ;;  %s1169_s5 = inlined_call_operand.hbm [shape: f32[20,128], index: 5, kind: output, shape index: {1}]   ;;  %s1170_s6 = inlined_call_operand.hbm [shape: f32[24,128], index: 6, kind: output, shape index: {2}]  }
   0x1   :  { %12 = sst [smem:[#allocation3]] %s1164_s0 }
   0x2   :  { %13 = vsyncpa [#allocation5], 0 }
   0x3   :  { %15 = vsyncpa [#allocation5 + $0x1], 0 }
   0x4   :  { %16 = vsyncpa [#allocation7], 0 }
   0x5   :  { %18 = vsyncpa [#allocation7 + $0x1], 0  ;;  %s925_s23 = smov 0   ;;  %s927_s24 = smov 0  }
   0x6   :  { %s929_s25 = smov 0   ;;  %s931_s26 = smov 0  }
   0x7 LB: > { %s946_s0 = sadd.s32 4294967295, %s880_s26   ;;  %s632_s27 = sadd.s32 4294967294, %s880_s26   ;;  %s880_s26 = sphi %s931_s26, %s1176_s26   ;;  %s876_s25 = sphi %s929_s25, %s1175_s25   ;;  %s872_s24 = sphi %s927_s24, %s1174_s24   ;;  %s868_s23 = sphi %s925_s23, %s1173_s23  }
   0x8   : > { %s950_s28 = sadd.s32 1, %s880_s26   ;;  %s104_s29 = sadd.s32 1, %s876_s25 }
   0x9   : > { %s101_s30 = ssub.s32 %s880_s26, %s950_s28  ;;  %p114_p0 = scmp.ne.s32.totalorder %s876_s25, %s872_s24 }
   0xa   : > { %p102_p1 = scmp.eq.s32.totalorder %s101_s30, 0  ;;  %p115_p2 = scmp.eq.s32.totalorder %s946_s0, 2 }
   0xb   : > { %p120_p3 = scmp.ne.s32.totalorder %s872_s24, %s868_s23  ;;  %p121_p4 = scmp.eq.s32.totalorder %s632_s27, 2 }
   0xc   : > { %s963_s7 = scalar_select %p102_p1, %s876_s25, %s104_s29  }
   0xd   : > { %p965_p5 = por %p115_p2, %p114_p0  ;;  %p969_p6 = por %p121_p4, %p120_p3 }
   0xe   : > { %p635_p7 = scmp.ge.s32.totalorder %s880_s26, 1  ;;  %p208_p8 = scmp.lt.s32.totalorder %s880_s26, 4 }
  0x10   : > { %p209_p9 = pnand %p635_p7, %p208_p8 }
  0x11   : > { %p249_p10 = scmp.lt.s32.totalorder (!%p209_p9), %s946_s0, 2  ;;  %s258_s10 = sld [smem:[#allocation3]] (!%p209_p9)  ;;  %v740_v5 = vld [vmem:[%s1167_s3] sm:$0xff] (!%p209_p9)   ;;  %v882_v6 = vmov (!%p209_p9), 0.0   ;;  %v741_v7 = vld [vmem:[%s1167_s3 + $0x8] sm:$0xff] (!%p209_p9)   ;;  %v742_v8 = vld [vmem:[%s1167_s3 + $0x10] sm:$0xff] (!%p209_p9)   ;;  %v262_v13 = vlaneseq (!%p209_p9) }
  0x12   : > { %212 = sbr.rel (%p209_p9) target bundleno = 714 (0x2ca), region = 32  ;;  %667 = vmatprep.subr.bf16.mxu0 (!%p209_p9), %v882_v6  ;;  %v743_v22 = vld [vmem:[%s1167_s3 + $0x18] sm:$0xff] (!%p209_p9)   ;;  %v744_v23 = vld [vmem:[%s1167_s3 + $0x20] sm:$0xff] (!%p209_p9)   ;;  %v745_v24 = vld [vmem:[%s1167_s3 + $0x28] sm:$0xff] (!%p209_p9)   ;;  %vm883_vm1 = vmmov (!%p209_p9), 0   ;;  %s232_s20 = sand.u32 (!%p209_p9), 1, %s872_s24  }
  0x13   : > { %668 = vmatpush3.bf16.msra.mxu0 (!%p209_p9), %v740_v5  ;;  %v996_v16 = vand.u32 (!%p209_p9), 127, %v262_v13  ;;  %v746_v25 = vld [vmem:[%s1167_s3 + $0x30] sm:$0xff] (!%p209_p9)   ;;  %v747_v26 = vld [vmem:[%s1167_s3 + $0x38] sm:$0xff] (!%p209_p9)   ;;  %683 = vmatprep.mubr.msk.bf16.mxu0 (!%p209_p9), %vm883_vm1, %v882_v6  ;;  %s1024_s21 = sshll.u32 (!%p209_p9), %s232_s20, 3  ;;  %s641_s29 = sshll.u32 (!%p209_p9), %s946_s0, 3  ;;  %v1031_v43 = vshrl.u32 (!%p209_p9), %v262_v13, 7 }
  0x14   : > { %669 = vmatprep.subr.bf16.mxu0 (!%p209_p9), %v882_v6  ;;  %s241_s22 = scalar_lea.vmem (!%p209_p9), [#allocation6], %s1024_s21  ;;  %v264_v44 = vstv (!%p209_p9), %s641_s29  ;;  %vm433_vm3 = vcmask (!%p209_p9), 7168   ;;  %vm413_vm5 = vcmask (!%p209_p9), 261120   ;;  %s234_s30 = scalar_lea.vmem (!%p209_p9), [#allocation4], %s1024_s21 }
  0x15   : > { %v1034_v45 = vadd.s32 (!%p209_p9), %v264_v44, %v1031_v43  ;;  %s884_s29 = smov (!%p209_p9), [#allocation6]  }
  0x17   : > { %v268_v2 = vstv (!%p209_p9), %s258_s10  ;;  %670 = vmatpush3.bf16.msra.mxu0 (!%p209_p9), %v741_v7  ;;  %vm266_vm4 = vcmp.lt.s32.totalorder (!%p209_p9), %v1034_v45, 20  ;;  %s455_s10 = sand.u32 (!%p209_p9), 1, %s946_s0  }
  0x18   : > { %671 = vmatprep.subr.bf16.mxu0 (!%p209_p9), %v882_v6 }
  0x19   : > { %s250_s11 = scalar_select %p249_p10, %s946_s0, 2 }
  0x1b   : > { %s639_s12 = sshll.u32 %s250_s11, 3  ;;  %672 = vmatpush3.bf16.msra.mxu0 %v742_v8  ;;  %s1044_s11 = sshll.u32 %s946_s0, 7 }
  0x1c   : > { %s252_s15 = scalar_lea.vmem %s1165_s1, %s639_s12  ;;  %s256_s18 = scalar_lea.vmem %s1166_s2, %s639_s12  ;;  %673 = vmatprep.subr.bf16.mxu0 %v882_v6 }
  0x1d   : > { %v259_v0 = vld [vmem:[%s252_s15] sm:$0xff]  ;;  %s1050_s14 = scalar_lea.hbm %s1169_s5, %s1044_s11  ;;  %s487_s15 = sshll.u32 %s241_s22, 4  ;;  %s1054_s15 = int_to_ptr.vmem [resolvable:$true] %s487_s15 }
  0x1e   : > { %v260_v1 = vld [vmem:[%s256_s18] sm:$0xff]  ;;  %415 = vmax.xlane.f32.xlu0 %v259_v0  ;;  %s1060_s18 = scalar_lea.hbm %s1168_s4, %s1044_s11  ;;  %s1062_s0 = scalar_lea.sflag [#allocation7], %s455_s10 }
  0x1f   : > { %v267_v3 = vadd.f32 %v260_v1, %v259_v0  ;;  %674 = vmatpush3.bf16.msra.mxu0 %v743_v22  ;;  %s758_s19 = scalar_lea.vmem %s1054_s15, 128  ;;  %s762_s12 = sshll.u32 %s884_s29, 4  ;;  %s763_s12 = int_to_ptr.vmem [resolvable:$false] %s762_s12 }
  0x20   : > { %675 = vmatprep.subr.bf16.mxu0 %v882_v6  ;;  %p759_p11 = scmp.ne.s32.totalorder %s1054_s15, %s758_s19  ;;  %p765_p0 = scmp.lt.s32.totalorder %s1054_s15, %s763_s12 }
  0x21   : > { %v269_v4 = vmul.f32 %v268_v2, %v267_v3 }
  0x22   : > { %p760_p12 = pnand %p759_p11, %p965_p5 }
  0x23   : > { %270 = vmax.xlane.f32.xlu0 %v269_v4  ;;  %676 = vmatpush3.bf16.msra.mxu0 %v744_v23 }
  0x24   : > { %677 = vmatprep.subr.bf16.mxu0 %v882_v6  ;;  %p761_p13 = pneg %p760_p12 }
  0x27   : > { %678 = vmatpush3.bf16.msra.mxu0 %v745_v24 }
  0x28   : > { %679 = vmatprep.subr.bf16.mxu0 %v882_v6 }
  0x2b   : > { %680 = vmatpush3.bf16.msra.mxu0 %v746_v25 }
  0x2c   : > { %681 = vmatprep.subr.bf16.mxu0 %v882_v6 }
  0x2f   : > { %682 = vmatpush3.bf16.msra.mxu0 %v747_v26 }
  0xab   : > { %v416_v9 = vpop.xlane.xlu0 %415 }
  0xac   : > { %v417_v10 = vsub.f32 %v259_v0, %v416_v9 }
  0xae   : > { %v418_v11 = vmul.f32 1.442695, %v417_v10 }
  0xb0   : > { %v271_v12 = vpop.xlane.xlu0 %270  ;;  %748 = vpow2.f32 %v418_v11 }
  0xb1   : > { %v301_v14 = vsub.f32 %v269_v4, %v271_v12  ;;  %vm274_vm0 = vcmp.eq.f32.partialorder %v269_v4, %v271_v12 }
  0xb2   : > { %v275_v17 = vsel %vm274_vm0, %v996_v16, 128 }
  0xb3   : > { %v302_v15 = vmul.f32 1.442695, %v301_v14  ;;  %v277_v19 = vshra.s32 %v275_v17, 16  ;;  %v276_v29 = vand.u32 65535, %v275_v17 }
  0xb5   : > { %750 = vpow2.f32 %v302_v15  ;;  %v279_v21 = vcvt.s32.f32 %v277_v19  ;;  %v278_v31 = vcvt.s32.f32 %v276_v29 }
  0xba   : > { %v749_v18 = vpop.eup %748 }
  0xbb   : > { %420 = vadd.xlane.f32.xlu1 %v749_v18 }
  0xbf   : > { %v751_v20 = vpop.eup %750 }
  0xc0   : > { %304 = vadd.xlane.f32.xlu1 %v751_v20 }
  0xc4   : > { %280 = vmin.xlane.f32.xlu1 %v279_v21 }
 0x148   : > { %v421_v27 = vpop.xlane.xlu1 %420 }
 0x149   : > { %752 = vrcp.f32 %v421_v27 }
 0x14a   : > { %754 = vlog2.f32 %v421_v27 }
 0x14d   : > { %v305_v28 = vpop.xlane.xlu1 %304 }
 0x14e   : > { %756 = vrcp.f32 %v305_v28 }
 0x151   : > { %v1020_v30 = vpop.xlane.xlu1 %280 }
 0x152   : > { %vm282_vm2 = vcmp.eq.f32.partialorder %v279_v21, %v1020_v30 }
 0x153   : > { %v283_v32 = vsel %vm282_vm2, %v278_v31, inf  ;;  %v753_v33 = vpop.eup %752 }
 0x154   : > { %284 = vmin.xlane.f32.xlu1 %v283_v32  ;;  %v755_v34 = vpop.eup %754  ;;  %v423_v35 = vmul.f32 %v753_v33, %v749_v18 }
 0x155   : > { %v426_v36 = vmul.f32 0.6931472, %v755_v34 }
 0x156   : > { %424 = vst [vmem:[%s241_s22] sm:$0xff] %v423_v35  ;;  %s764_s22 = scalar_lea.vmem %s763_s12, 256 }
 0x157   : > { %v427_v38 = vsub.f32 %v417_v10, %v426_v36  ;;  %p766_p1 = scmp.lt.s32.totalorder %s764_s22, %s758_s19 }
 0x158   : > { %v757_v37 = vpop.eup %756 }
 0x159   : > { %v307_v39 = vmul.f32 %v757_v37, %v751_v20  ;;  %v428_v40 = vadd.f32 4.8520303, %v427_v38  ;;  %p767_p2 = por %p766_p1, %p765_p0 }
 0x15b   : > { %v324_v41 = vpack.c.bf16 %v307_v39, %v307_v39  ;;  %v429_v42 = vmul.f32 %v428_v40, %v423_v35  ;;  %p768_p3 = pnand %p767_p2, %p761_p13 }
 0x15d   : > { %684 = vmatmul.mubr.bf16.vlgmr.msra.gmra.mrb[0].mxu0 %v324_v41  ;;  %430 = vadd.xlane.f32.xlu0 %v429_v42 }
 0x1ea   : > { %v431_v46 = vpop.xlane.xlu0 %430 }
 0x1eb   : > { %v432_v47 = vsel %vm266_vm4, %v431_v46, 0.0 }
 0x1ec   : > { %v434_v48 = vsel %vm433_vm3, %v432_v47, 0.0 }
 0x1ed   : > { %435 = vadd.xlane.f32.xlu0 %v434_v48 }
 0x230   : > { %v407_v49 = vpop.f32.mrb[0].mxu0 }
 0x231   : > { %414 = vst.msk [vmem:[%s234_s30] sm:$0xff] %vm413_vm5, %v407_v49  ;;  %v685_v50 = vpop.f32.mrb[1].mxu0 }
 0x232   : > { %v410_v51 = vpop.f32.mrb[2].mxu0 }
 0x233   : > { %v686_v52 = vpop.f32.mrb[3].mxu0 }
 0x234   : > { %771 = shalt.err (!%p768_p3)
}
 0x235   : > { %s772_s10 = scalar_lea.hbm %s1050_s14, 128  ;;  %s776_s17 = scalar_lea.hbm %s1169_s5, 384 }
 0x236   : > { %p773_p4 = scmp.ne.s32.totalorder %s1050_s14, %s772_s10  ;;  %p777_p9 = scmp.lt.u32.totalorder %s1050_s14, %s1169_s5 }
 0x237   : > { %p778_p10 = scmp.lt.u32.totalorder %s776_s17, %s772_s10  ;;  %p780_p12 = scmp.lt.u32.totalorder %s772_s10, %s1050_s14 }
 0x238   : > { %p774_p7 = pnand %p773_p4, %p965_p5 }
 0x239   : > { %p779_p11 = por %p778_p10, %p777_p9 }
 0x23a   : > { %p775_p8 = pneg %p774_p7 }
 0x23b   : > { %p781_p13 = por %p780_p12, %p779_p11 }
 0x23d   : > { %p782_p0 = pnand %p781_p13, %p775_p8 }
 0x23f   : > { %785 = shalt.err (!%p782_p0)
}
 0x240   : > { %690 = dma.vmem_to_hbm [thread:$0]  (%p965_p5), %s1054_s15, 128, %s1050_s14, %s1062_s0  }
 0x241   : > { %s474_s19 = sshll.u32 %s234_s30, 4  ;;  %s451_s22 = scalar_lea.sflag [#allocation5], %s232_s20  ;;  %s475_s19 = int_to_ptr.vmem [resolvable:$true] %s474_s19 }
 0x242   : > { %s786_s13 = scalar_lea.vmem %s475_s19, 128  ;;  %s885_s10 = smov [#allocation4]  }
 0x243   : > { %p787_p1 = scmp.ne.s32.totalorder %s475_s19, %s786_s13  ;;  %s790_s16 = sshll.u32 %s885_s10, 4  ;;  %s791_s16 = int_to_ptr.vmem [resolvable:$false] %s790_s16 }
 0x244   : > { %s792_s17 = scalar_lea.vmem %s791_s16, 256  ;;  %p793_p4 = scmp.lt.s32.totalorder %s475_s19, %s791_s16 }
 0x245   : > { %p788_p2 = pnand %p787_p1, %p965_p5  ;;  %p794_p7 = scmp.lt.s32.totalorder %s792_s17, %s786_s13 }
 0x247   : > { %p789_p3 = pneg %p788_p2  ;;  %p795_p8 = por %p794_p7, %p793_p4 }
 0x249   : > { %p796_p9 = pnand %p795_p8, %p789_p3 }
 0x24b   : > { %799 = shalt.err (!%p796_p9)
}
 0x24c   : > { %s800_s20 = scalar_lea.hbm %s1060_s18, 128  ;;  %s804_s15 = scalar_lea.hbm %s1168_s4, 384 }
 0x24d   : > { %p801_p10 = scmp.ne.s32.totalorder %s1060_s18, %s800_s20  ;;  %p805_p13 = scmp.lt.u32.totalorder %s1060_s18, %s1168_s4 }
 0x24e   : > { %p806_p0 = scmp.lt.u32.totalorder %s804_s15, %s800_s20  ;;  %p808_p2 = scmp.lt.u32.totalorder %s800_s20, %s1060_s18 }
 0x24f   : > { %p802_p11 = pnand %p801_p10, %p965_p5 }
 0x250   : > { %p807_p1 = por %p806_p0, %p805_p13 }
 0x251   : > { %p803_p12 = pneg %p802_p11 }
 0x252   : > { %p809_p3 = por %p808_p2, %p807_p1 }
 0x254   : > { %p810_p4 = pnand %p809_p3, %p803_p12 }
 0x256   : > { %813 = shalt.err (!%p810_p4)
}
 0x257   : > { %689 = dma.vmem_to_hbm [thread:$0]  (%p965_p5), %s475_s19, 128, %s1060_s18, %s451_s22   ;;  %v285_v60 = vpop.xlane.xlu1 %284  ;;  %v287_v61 = vcvt.f32.s32 %v1020_v30  ;;  %vm445_vm8 = vcmp.eq.s32.totalorder %v1031_v43, 1  ;;  %vm444_vm9 = vcmp.eq.s32.totalorder %v1031_v43, 0 }
 0x258   : > { %v286_v62 = vcvt.f32.s32 %v285_v60  ;;  %s248_s18 = scalar_lea.vmem [#allocation8], %s1024_s21  ;;  %s1119_s16 = scalar_lea.hbm %s1170_s6, %s1044_s11 }
 0x259   : > { %v288_v63 = vshll.u32 %v287_v61, 16  ;;  %s500_s19 = sshll.u32 %s248_s18, 4  ;;  %s886_s17 = smov [#allocation8]   ;;  %s1121_s19 = int_to_ptr.vmem [resolvable:$true] %s500_s19 }
 0x25a   : > { %s814_s21 = scalar_lea.vmem %s1121_s19, 128  ;;  %s818_s20 = sshll.u32 %s886_s17, 4  ;;  %s819_s20 = int_to_ptr.vmem [resolvable:$false] %s818_s20 }
 0x25b   : > { %v289_v0 = vadd.s32 %v288_v63, %v286_v62  ;;  %p815_p7 = scmp.ne.s32.totalorder %s1121_s19, %s814_s21  ;;  %s820_s30 = scalar_lea.vmem %s819_s20, 256 }
 0x25c   : > { %p821_p10 = scmp.lt.s32.totalorder %s1121_s19, %s819_s20  ;;  %p822_p11 = scmp.lt.s32.totalorder %s820_s30, %s814_s21 }
 0x25d   : > { %vm290_vm6 = vcmp.eq.s32.totalorder %v996_v16, %v289_v0  ;;  %p816_p8 = pnand %p815_p7, %p965_p5 }
 0x25e   : > { %vm293_vm7 = vmand %vm266_vm4, %vm290_vm6  ;;  %p823_p12 = por %p822_p11, %p821_p10 }
 0x25f   : > { %v294_v1 = vsel %vm293_vm7, 1.0, %v882_v6  ;;  %p817_p9 = pneg %p816_p8 }
 0x260   : > { %v295_v2 = vrot.slane %v294_v1, 4 }
 0x261   : > { %p824_p13 = pnand %p823_p12, %p817_p9 }
 0x262   : > { %v296_v3 = vadd.f32 %v295_v2, %v294_v1 }
 0x264   : > { %v297_v4 = vrot.slane %v296_v3, 2 }
 0x266   : > { %v298_v5 = vadd.f32 %v297_v4, %v296_v3 }
 0x268   : > { %v299_v7 = vrot.slane %v298_v5, 1 }
 0x26a   : > { %v300_v8 = vadd.f32 %v299_v7, %v298_v5 }
 0x27a   : > { %v436_v53 = vpop.xlane.xlu0 %435 }
 0x27b   : > { %v437_v54 = vrot.slane %v436_v53, 4 }
 0x27d   : > { %v438_v55 = vadd.f32 %v437_v54, %v436_v53 }
 0x27f   : > { %v439_v56 = vrot.slane %v438_v55, 2 }
 0x281   : > { %v440_v57 = vadd.f32 %v439_v56, %v438_v55 }
 0x283   : > { %v441_v58 = vrot.slane %v440_v57, 1 }
 0x285   : > { %v442_v59 = vadd.f32 %v441_v58, %v440_v57 }
 0x287   : > { %687 = vpush %v442_v59 }
 0x2b8   : > { %s688_s22 = spop %687 }
 0x2b9   : > { %v446_v9 = vstv %s688_s22 }
 0x2ba   : > { %v447_v10 = vsel %vm445_vm8, %v446_v9, 0.0 }
 0x2bb   : > { %v448_v6 = vsel %vm444_vm9, %v300_v8, %v447_v10 }
 0x2bc   : > { %449 = vst [vmem:[%s248_s18] sm:$0xff] %v448_v6 }
 0x2bd   : > { %827 = shalt.err (!%p824_p13)
}
 0x2be   : > { %s828_s11 = scalar_lea.hbm %s1119_s16, 128  ;;  %s832_s29 = scalar_lea.hbm %s1170_s6, 384 }
 0x2bf   : > { %p829_p0 = scmp.ne.s32.totalorder %s1119_s16, %s828_s11  ;;  %p833_p3 = scmp.lt.u32.totalorder %s1119_s16, %s1170_s6 }
 0x2c0   : > { %p834_p4 = scmp.lt.u32.totalorder %s832_s29, %s828_s11  ;;  %p836_p8 = scmp.lt.u32.totalorder %s828_s11, %s1119_s16 }
 0x2c1   : > { %p830_p1 = pnand %p829_p0, %p965_p5 }
 0x2c2   : > { %p835_p7 = por %p834_p4, %p833_p3 }
 0x2c3   : > { %p831_p2 = pneg %p830_p1 }
 0x2c4   : > { %p837_p9 = por %p836_p8, %p835_p7 }
 0x2c6   : > { %p838_p10 = pnand %p837_p9, %p831_p2 }
 0x2c8   : > { %841 = shalt.err (!%p838_p10)
}
 0x2c9   : > { %691 = dma.vmem_to_hbm [thread:$0]  (%p965_p5), %s1121_s19, 128, %s1119_s16, %s1062_s0  }
 0x2ca PF: > { %p705_p11 = scmp.ge.s32.totalorder %s880_s26, 2  ;;  %s512_s22 = sand.u32 1, %s868_s23  }
 0x2cb   : > { %s513_s13 = scalar_lea.sflag [#allocation5], %s512_s22 }
 0x2cc   : > { %p696_p12 = pnand %p705_p11, %p969_p6 }
 0x2ce   : > { %859 = dma.done.wait (!%p696_p12), %s513_s13, 128  }
 0x2cf   : > { %861 = vsyncadd (!%p696_p12), %s513_s13, 4294967168  ;;  %s521_s10 = sand.u32 1, %s632_s27  }
 0x2d0   : > { %s522_s21 = scalar_lea.sflag [#allocation7], %s521_s10 }
 0x2d1   : > { %863 = dma.done.wait (!%p696_p12), %s522_s21, 256  }
 0x2d2   : > { %865 = vsyncadd (!%p696_p12), %s522_s21, 4294967040  ;;  %p21_p5 = scmp.ge.s32.totalorder %s950_s28, 5   ;;  %s1173_s23 = smov %s872_s24 }
 0x2d3   : > { %s1174_s24 = smov %s876_s25  ;;  %s1175_s25 = smov %s963_s7 }
 0x2d4   : > { %s1176_s26 = smov %s950_s28  ;;  %23 = sbr.rel (!%p21_p5) target bundleno = 7 (0x7), region = 102 }
 0x2db   :  { %536 = vsyncpa [#allocation5], 1 }
 0x2dc   :  { %538 = vsyncpa [#allocation5 + $0x1], 1 }
 0x2dd   :  { %539 = vsyncpa [#allocation7], 1 }
 0x2de   :  { %541 = vsyncpa [#allocation7 + $0x1], 1 }

</bundles_post_ra>
